<compile_context>
chip_gen: v7x
topology: tpu7x:2x2x1
jax: 0.10.0
libtpu: 0.0.40
codegen_flags: <defaults>
</compile_context>

<pallas_src>
import functools

import jax
import jax.numpy as jnp
from jax.experimental import pallas as pl
from jax.experimental.pallas import tpu as pltpu


# ---------------------------------------------------------------------------
# helpers
# ---------------------------------------------------------------------------
def _divisors(n):
    out = []
    i = 1
    while i * i <= n:
        if n % i == 0:
            out.append(i)
            if i != n // i:
                out.append(n // i)
        i += 1
    return sorted(out)


def _vmem_limit_bytes():
    """Scoped-VMEM budget derived from the device's physical VMEM (with headroom)."""
    cap = 64 * 1024 * 1024
    try:
        info = pltpu.get_tpu_info()
        cap = int(getattr(info, "vmem_capacity_bytes", cap)) or cap
    except Exception:
        pass
    return max(32 * 1024 * 1024, min(int(cap * 3 // 4), 100 * 1024 * 1024))


def _pick_spatial_tile(S, cin, itemsize, target_bytes):
    """Largest 128-aligned divisor of S whose (cin, ts) input block stays under target."""
    if S % 128 != 0:
        return S
    desired = max(128, target_bytes // max(1, cin * itemsize))
    cands = [128 * d for d in _divisors(S // 128)]
    fitting = [c for c in cands if c <= desired]
    return max(fitting) if fitting else min(cands)


def _pick_d_block(D, HW, itemsize, cin, cout, vmem_limit):
    """How many consecutive depth slices each kernel-2 grid step handles."""
    quals = [d for d in _divisors(D) if (d * HW) % 128 == 0 or d == D]
    budget = int(vmem_limit * 0.6)
    target_out = 2 * 1024 * 1024            # aim for >= ~2 MiB output DMAs per step

    def per_step(d):
        in_b = cin * d * HW * itemsize
        out_b = cout * d * 4 * HW * itemsize
        return 2 * (in_b + out_b), out_b    # x2 for double-buffering

    fitting = [d for d in quals if per_step(d)[0] <= budget and d <= 32]
    if not fitting:
        return min(quals)
    for d in fitting:                        # smallest block that reaches the DMA target
        if per_step(d)[1] >= target_out:
            return d
    return max(fitting)


# ---------------------------------------------------------------------------
# Kernel 1: BN batch statistics via Gram accumulation.  Streams x once; per tile it
# only does one small MXU matmul (Cin x Cin) and a per-row sum.  Never materializes Y.
# ---------------------------------------------------------------------------
def stats_kernel(x_ref, gram_ref, sum_ref):
    @pl.when(pl.program_id(2) == 0)
    def _init():
        gram_ref[...] = jnp.zeros_like(gram_ref)
        sum_ref[...] = jnp.zeros_like(sum_ref)

    x = x_ref[0]                                                   # (Cin, ts)
    # "NT" matmul x @ x^T: contraction over the large spatial (lane) axis on the MXU.
    gram = jax.lax.dot_general(x, x, (((1,), (1,)), ((), ())),
                               preferred_element_type=jnp.float32)  # (Cin, Cin)
    ssum = jnp.sum(x.astype(jnp.float32), axis=1, keepdims=True)    # (Cin, 1)
    gram_ref[0, 0] += gram
    sum_ref[0, 0] += ssum


# ---------------------------------------------------------------------------
# Kernel 2: conv (both kd taps) + fused BN affine (+ optional ReLU) for a block of
# consecutive d, written directly in the final (N, Cout, 2D, 2H, W) memory layout.
# ---------------------------------------------------------------------------
def conv_bn_kernel(x_ref, w_ref, scale_ref, shift_ref, o_ref, *, d_blk, H, W, apply_relu):
    HW = H * W
    L = 2 * HW
    xt = x_ref[0].T                          # (d_blk*HW, Cin): rows ordered (d, h, w)
    scale = scale_ref[...]                   # (1, Cout) f32
    shift = shift_ref[...]
    for kd in range(2):                      # static unroll over the upsampled-D taps
        y0 = jnp.dot(xt, w_ref[2 * kd + 0], preferred_element_type=jnp.float32)
        y1 = jnp.dot(xt, w_ref[2 * kd + 1], preferred_element_type=jnp.float32)
        cout = y0.shape[-1]
        # Interleave the two kh taps at W granularity -> rows ordered (d, h, kh, w).
        # (Pure row-regroup: the minor dim (Cout) is untouched.)
        y0 = y0.reshape(d_blk * H, 1, W, cout)
        y1 = y1.reshape(d_blk * H, 1, W, cout)
        y = jnp.concatenate([y0, y1], axis=1).reshape(d_blk * L, cout)
        y = y * scale + shift                # fused per-channel BatchNorm affine
        if apply_relu:
            y = jnp.maximum(y, 0.0)
        yt = y.T                             # (Cout, d_blk*L) channels-major for the store
        for dd in range(d_blk):              # lane-dense, 128-aligned stores (final layout)
            o_ref[0, :, (2 * dd + kd) * L:(2 * dd + kd + 1) * L] = (
                yt[:, dd * L:(dd + 1) * L].astype(o_ref.dtype))


# ---------------------------------------------------------------------------
# wrapper
# ---------------------------------------------------------------------------
def tconv_hw_forward(x, weight, gamma, beta, *, eps=1e-5, nonlin=None):
    """Forward of TConvHW.

    x:      (N, Cin, D, H, W)
    weight: (Cin, Cout, 2, 2, 1)   (PyTorch ConvTranspose3d layout)
    gamma, beta: (Cout,)           BatchNorm affine parameters
    Returns (N, Cout, 2*D, 2*H, W).  BatchNorm uses batch statistics (training-mode
    forward, biased variance), matching the PyTorch module's default behaviour.
    """
    N, Cin, D, H, W = x.shape
    Cin_w, Cout, kD, kH, kW = weight.shape
    assert (kD, kH, kW) == (2, 2, 1) and Cin_w == Cin

    S = D * H * W
    HW = H * W
    L = 2 * HW
    # Lane alignment required by the fused in-place-layout output path.
    # TODO(synk): add a fallback ((N, 4*Cout, S) intermediate + XLA rearrange) for
    # shapes where 2*H*W is not a multiple of 128.
    assert L % 128 == 0, "fused output path requires (2*H*W) % 128 == 0"

    if x.dtype not in (jnp.bfloat16, jnp.float32):
        x = x.astype(jnp.float32)
    cdt = x.dtype
    esize = x.dtype.itemsize
    vmem_limit = _vmem_limit_bytes()

    # Tiny one-time weight rearrangements (XLA, negligible).
    w0 = weight[..., 0]                                   # (Cin, Cout, 2, 2)
    wk = jnp.transpose(w0, (2, 3, 0, 1))                  # (kd, kh, Cin, Cout)
    w4 = wk.reshape(4, Cin, Cout).astype(cdt)             # kernel-2 weights (VMEM resident)
    wt_flat = (jnp.transpose(wk, (0, 1, 3, 2))            # (kd, kh, Cout, Cin)
               .reshape(4 * Cout, Cin).astype(jnp.float32))

    # ---- Pallas kernel 1: Gram statistics (single streaming pass over x) --------
    x3 = x.reshape(N, Cin, S)                              # free reshape, no transpose
    ts = _pick_spatial_tile(S, Cin, esize, target_bytes=min(8 << 20, vmem_limit // 8))
    n_tiles = S // ts
    n_chunks = 2 if (N < 2 and n_tiles % 2 == 0 and n_tiles >= 2) else 1
    tiles_per_chunk = n_tiles // n_chunks

    g_parts, s_parts = pl.pallas_call(
        stats_kernel,
        out_shape=(
            jax.ShapeDtypeStruct((N, n_chunks, Cin, Cin), jnp.float32),
            jax.ShapeDtypeStruct((N, n_chunks, Cin, 1), jnp.float32),
        ),
        grid_spec=pltpu.PrefetchScalarGridSpec(
            num_scalar_prefetch=0,
            grid=(N, n_chunks, tiles_per_chunk),
            in_specs=[
                pl.BlockSpec((1, Cin, ts),
                             lambda n, c, t: (n, 0, c * tiles_per_chunk + t)),
            ],
            out_specs=(
                pl.BlockSpec((1, 1, Cin, Cin), lambda n, c, t: (n, c, 0, 0)),
                pl.BlockSpec((1, 1, Cin, 1), lambda n, c, t: (n, c, 0, 0)),
            ),
        ),
        compiler_params=pltpu.CompilerParams(
            dimension_semantics=("parallel", "parallel", "arbitrary"),
            vmem_limit_bytes=vmem_limit,
        ),
    )(x3)

    # ---- tiny reductions -> fused BN scale / shift -------------------------------
    # NOTE: single-pass E[y^2] - E[y]^2 (can cancel for strongly biased activations).
    gram = jnp.sum(g_parts, axis=(0, 1))                   # (Cin, Cin)
    ssum = jnp.sum(s_parts, axis=(0, 1))                   # (Cin, 1)
    ch_sum = (wt_flat @ ssum)[:, 0].reshape(4, Cout).sum(axis=0)
    ch_sq = jnp.sum((wt_flat @ gram) * wt_flat, axis=1).reshape(4, Cout).sum(axis=0)
    count = jnp.float32(4 * N * S)                         # elements per output channel
    mean = ch_sum / count
    var = jnp.maximum(ch_sq / count - mean * mean, 0.0)    # biased variance (train mode)
    inv_std = jax.lax.rsqrt(var + eps)
    scale = gamma.astype(jnp.float32) * inv_std
    shift = beta.astype(jnp.float32) - mean * scale
    scale_row = scale.reshape(1, Cout)
    shift_row = shift.reshape(1, Cout)

    # ---- Pallas kernel 2: conv + BN affine, output written in the final layout ----
    d_blk = _pick_d_block(D, HW, esize, Cin, Cout, vmem_limit)
    apply_relu = nonlin == "relu"
    o_flat = pl.pallas_call(
        functools.partial(conv_bn_kernel, d_blk=d_blk, H=H, W=W, apply_relu=apply_relu),
        out_shape=jax.ShapeDtypeStruct((N, Cout, 2 * D * L), cdt),
        grid_spec=pltpu.PrefetchScalarGridSpec(
            num_scalar_prefetch=0,
            grid=(N, D // d_blk),
            in_specs=[
                pl.BlockSpec((1, Cin, d_blk * HW), lambda n, db: (n, 0, db)),
                pl.BlockSpec((4, Cin, Cout), lambda n, db: (0, 0, 0)),   # resident
                pl.BlockSpec((1, Cout), lambda n, db: (0, 0)),           # resident
                pl.BlockSpec((1, Cout), lambda n, db: (0, 0)),           # resident
            ],
            out_specs=pl.BlockSpec((1, Cout, d_blk * 2 * L), lambda n, db: (n, 0, db)),
        ),
        compiler_params=pltpu.CompilerParams(
            dimension_semantics=("parallel", "parallel"),
            vmem_limit_bytes=vmem_limit,
        ),
    )(x3, w4, scale_row, shift_row)

    # FREE reshape: blocks were written in (n, co, d, kd, h, kh, w) memory order.
    out = o_flat.reshape(N, Cout, 2 * D, 2 * H, W)
    if nonlin is not None and not apply_relu:
        # TODO(synk): arbitrary nonlin callables are applied outside the kernel (not fused).
        out = nonlin(out)
    # TODO(synk): BatchNorm running_mean / running_var buffer updates are stateful
    # and not modelled here.
    return out


if __name__ == "__main__":
    key = jax.random.PRNGKey(0)
    kx, kw = jax.random.split(key)

    # Small shapes consistent with the module (NCDHW); 2*H*W = 128 keeps lanes aligned.
    N, Cin, Cout, D, H, W = 2, 4, 8, 8, 8, 8
    x = jax.random.normal(kx, (N, Cin, D, H, W), dtype=jnp.float32)
    weight = 0.1 * jax.random.normal(kw, (Cin, Cout, 2, 2, 1), dtype=jnp.float32)
    gamma = jnp.ones((Cout,), jnp.float32)   # BatchNorm3d default affine init
    beta = jnp.zeros((Cout,), jnp.float32)

    out = jax.block_until_ready(tconv_hw_forward(x, weight, gamma, beta, nonlin=None))
    assert out.shape == (N, Cout, 2 * D, 2 * H, W)

    # Pure-JAX reference (ConvTranspose3d with stride == kernel, then BN train mode).
    ref_conv = jnp.einsum("ncdhw,copq->nodphqw", x, weight[..., 0]).reshape(
        N, Cout, 2 * D, 2 * H, W)
    mu = ref_conv.mean(axis=(0, 2, 3, 4), keepdims=True)
    var = ref_conv.var(axis=(0, 2, 3, 4), keepdims=True)  # biased
    ref = (gamma.reshape(1, -1, 1, 1, 1) * (ref_conv - mu) / jnp.sqrt(var + 1e-5)
           + beta.reshape(1, -1, 1, 1, 1))
    assert jnp.allclose(out, ref, atol=1e-3, rtol=1e-3), "mismatch vs reference"

    print("KERNEL_OK")
</pallas_src>

<mosaic_0001>
module attributes {stable_mosaic.version = 11 : i64} {
  func.func @stats_kernel(%arg0: i32, %arg1: i32, %arg2: i32, %arg3: memref<1x4x512xf32, #tpu.memory_space<vmem>>, %arg4: memref<1x1x4x4xf32, #tpu.memory_space<vmem>>, %arg5: memref<1x1x4x1xf32, #tpu.memory_space<vmem>>) attributes {dimension_semantics = [#tpu.dimension_semantics<parallel>, #tpu.dimension_semantics<parallel>, #tpu.dimension_semantics<arbitrary>], iteration_bounds = array<i64: 2, 1, 1>, scalar_prefetch = 0 : i64, scratch_operands = 0 : i64, tpu.core_type = #tpu.core_type<tc>, window_params = [{transform_indices = @transform_0, window_bounds = array<i64: 1, 4, 512>}, {transform_indices = @transform_1, window_bounds = array<i64: 1, 1, 4, 4>}, {transform_indices = @transform_2, window_bounds = array<i64: 1, 1, 4, 1>}]} {
    %c0_i32 = arith.constant 0 : i32
    %0 = arith.cmpi eq, %arg2, %c0_i32 : i32
    %1 = arith.extui %0 : i1 to i32
    %c0_i32_0 = arith.constant 0 : i32
    %2 = arith.cmpi ne, %1, %c0_i32_0 : i32
    scf.if %2 {
      %cst_20 = arith.constant 0.000000e+00 : f32
      %20 = vector.broadcast %cst_20 : f32 to vector<1x1x4x4xf32>
      %c0_21 = arith.constant 0 : index
      %c0_22 = arith.constant 0 : index
      %c0_23 = arith.constant 0 : index
      %c0_24 = arith.constant 0 : index
      %21 = vector.load %arg4[%c0_21, %c0_22, %c0_23, %c0_24] : memref<1x1x4x4xf32, #tpu.memory_space<vmem>>, vector<1x1x4x4xf32>
      tpu.vector_store %arg4[%c0_21, %c0_22, %c0_23, %c0_24], %20 {strides = array<i32>} : memref<1x1x4x4xf32, #tpu.memory_space<vmem>>, vector<1x1x4x4xf32>,
      %cst_25 = arith.constant 0.000000e+00 : f32
      %22 = vector.broadcast %cst_25 : f32 to vector<1x1x4x1xf32>
      %c0_26 = arith.constant 0 : index
      %c0_27 = arith.constant 0 : index
      %c0_28 = arith.constant 0 : index
      %c0_29 = arith.constant 0 : index
      %23 = vector.load %arg5[%c0_26, %c0_27, %c0_28, %c0_29] : memref<1x1x4x1xf32, #tpu.memory_space<vmem>>, vector<1x1x4x1xf32>
      tpu.vector_store %arg5[%c0_26, %c0_27, %c0_28, %c0_29], %22 {strides = array<i32>} : memref<1x1x4x1xf32, #tpu.memory_space<vmem>>, vector<1x1x4x1xf32>,
    } else {
    }
    %c0 = arith.constant 0 : index
    %c0_1 = arith.constant 0 : index
    %c0_2 = arith.constant 0 : index
    %3 = vector.load %arg3[%c0, %c0_1, %c0_2] : memref<1x4x512xf32, #tpu.memory_space<vmem>>, vector<1x4x512xf32>
    %4 = vector.shape_cast %3 : vector<1x4x512xf32> to vector<4x512xf32>
    %cst = arith.constant dense<0.000000e+00> : vector<4x4xf32>
    %5 = tpu.matmul %4, %4, %cst {dimension_numbers = #tpu.dot_dimension_numbers<[1], [1], [0], [0], [0, 0, 1, 0], [], []>} : vector<4x512xf32>, vector<4x512xf32>, vector<4x4xf32> -> vector<4x4xf32>
    %cst_3 = arith.constant dense<0.000000e+00> : vector<4xf32>
    %6 = vector.multi_reduction <add>, %4, %cst_3 [1] : vector<4x512xf32> to vector<4xf32>
    %7 = vector.shape_cast %6 : vector<4xf32> to vector<4x1xf32>
    %c0_4 = arith.constant 0 : index
    %c0_5 = arith.constant 0 : index
    %c0_6 = arith.constant 0 : index
    %c0_7 = arith.constant 0 : index
    %8 = vector.load %arg4[%c0_4, %c0_5, %c0_6, %c0_7] : memref<1x1x4x4xf32, #tpu.memory_space<vmem>>, vector<1x1x4x4xf32>
    %9 = vector.shape_cast %8 : vector<1x1x4x4xf32> to vector<4x4xf32>
    %10 = arith.addf %9, %5 : vector<4x4xf32>
    %c0_8 = arith.constant 0 : index
    %c0_9 = arith.constant 0 : index
    %c0_10 = arith.constant 0 : index
    %c0_11 = arith.constant 0 : index
    %11 = vector.load %arg4[%c0_8, %c0_9, %c0_10, %c0_11] : memref<1x1x4x4xf32, #tpu.memory_space<vmem>>, vector<1x1x4x4xf32>
    %12 = vector.shape_cast %11 : vector<1x1x4x4xf32> to vector<4x4xf32>
    %13 = vector.shape_cast %10 : vector<4x4xf32> to vector<1x1x4x4xf32>
    tpu.vector_store %arg4[%c0_8, %c0_9, %c0_10, %c0_11], %13 {strides = array<i32>} : memref<1x1x4x4xf32, #tpu.memory_space<vmem>>, vector<1x1x4x4xf32>,
    %c0_12 = arith.constant 0 : index
    %c0_13 = arith.constant 0 : index
    %c0_14 = arith.constant 0 : index
    %c0_15 = arith.constant 0 : index
    %14 = vector.load %arg5[%c0_12, %c0_13, %c0_14, %c0_15] : memref<1x1x4x1xf32, #tpu.memory_space<vmem>>, vector<1x1x4x1xf32>
    %15 = vector.shape_cast %14 : vector<1x1x4x1xf32> to vector<4x1xf32>
    %16 = arith.addf %15, %7 : vector<4x1xf32>
    %c0_16 = arith.constant 0 : index
    %c0_17 = arith.constant 0 : index
    %c0_18 = arith.constant 0 : index
    %c0_19 = arith.constant 0 : index
    %17 = vector.load %arg5[%c0_16, %c0_17, %c0_18, %c0_19] : memref<1x1x4x1xf32, #tpu.memory_space<vmem>>, vector<1x1x4x1xf32>
    %18 = vector.shape_cast %17 : vector<1x1x4x1xf32> to vector<4x1xf32>
    %19 = vector.shape_cast %16 : vector<4x1xf32> to vector<1x1x4x1xf32>
    tpu.vector_store %arg5[%c0_16, %c0_17, %c0_18, %c0_19], %19 {strides = array<i32>} : memref<1x1x4x1xf32, #tpu.memory_space<vmem>>, vector<1x1x4x1xf32>,
    return
  }
  func.func @transform_0(%arg0: i32, %arg1: i32, %arg2: i32) -> (i32, i32, i32) {
    %c1_i32 = arith.constant 1 : i32
    %0 = arith.muli %arg1, %c1_i32 : i32
    %1 = arith.addi %0, %arg2 : i32
    %c0_i32 = arith.constant 0 : i32
    %c0_i32_0 = arith.constant 0 : i32
    return %arg0, %c0_i32, %1 : i32, i32, i32
  }
  func.func @transform_1(%arg0: i32, %arg1: i32, %arg2: i32) -> (i32, i32, i32, i32) {
    %c0_i32 = arith.constant 0 : i32
    %c0_i32_0 = arith.constant 0 : i32
    %c0_i32_1 = arith.constant 0 : i32
    return %arg0, %arg1, %c0_i32, %c0_i32_0 : i32, i32, i32, i32
  }
  func.func @transform_2(%arg0: i32, %arg1: i32, %arg2: i32) -> (i32, i32, i32, i32) {
    %c0_i32 = arith.constant 0 : i32
    %c0_i32_0 = arith.constant 0 : i32
    %c0_i32_1 = arith.constant 0 : i32
    return %arg0, %arg1, %c0_i32, %c0_i32_0 : i32, i32, i32, i32
  }
}

</mosaic_0001>

<bundles_post_ra>
// kernel: tpu_custom_call.1
= control target key start
LH: loop header
LB: loop body
LE: loop exit
PB: predicated region body
PF: predicated region fallthrough
CT: control target
= control target key end

     0   :  { %8 = vsyncpa [#allocation3], 0  ;;  %s918_s0 = inlined_call_operand.hbm [shape: f32[2,4,512], index: 0, kind: input, shape index: {}]   ;;  %s919_s1 = inlined_call_operand.hbm [shape: f32[2,1,4,4], index: 1, kind: output, shape index: {0}]   ;;  %s920_s2 = inlined_call_operand.vmem [shape: f32[2,1,4,1], index: 2, kind: output, shape index: {1}]  }
   0x1   :  { %10 = vsyncpa [#allocation3 + $0x1], 0 }
   0x2   :  { %11 = vsyncpa [#allocation4], 0 }
   0x3   :  { %13 = vsyncpa [#allocation4 + $0x1], 0  ;;  %s738_s9 = smov 0   ;;  %s740_s10 = smov 0  }
   0x4   :  { %s742_s11 = smov 0   ;;  %s744_s12 = smov 0  }
   0x5   :  { %s746_s13 = smov 0   ;;  %s748_s14 = smov 0  }
   0x6 LB: > { %s525_s15 = sadd.s32 4294967295, %s718_s14   ;;  %s526_s16 = sadd.s32 4294967294, %s718_s14   ;;  %s718_s14 = sphi %s748_s14, %s19_s14   ;;  %s714_s13 = sphi %s746_s13, %s936_s13   ;;  %s710_s12 = sphi %s744_s12, %s935_s12   ;;  %s706_s11 = sphi %s742_s11, %s934_s11   ;;  %s702_s10 = sphi %s740_s10, %s933_s10   ;;  %s698_s9 = sphi %s738_s9, %s932_s9  }
   0x7   : > { %s38_s17 = sadd.s32 1, %s714_s13  ;;  %s49_s18 = sadd.s32 1, %s706_s11 }
   0x8   : > { %p40_p0 = scmp.ge.s32.totalorder %s38_s17, 2  ;;  %p56_p1 = scmp.ne.s32.totalorder %s706_s11, %s702_s10 }
   0x9   : > { %p57_p2 = scmp.eq.s32.totalorder %s718_s14, 0  ;;  %p62_p3 = scmp.ne.s32.totalorder %s702_s10, %s698_s9 }
   0xa   : > { %s938_s17 = smov (%p40_p0, %s38_s17), 0  ;;  %p63_p5 = scmp.eq.s32.totalorder %s525_s15, 0 }
   0xb   : > { %p779_p4 = por %p57_p2, %p56_p1  ;;  %s44_s20 = ssub.s32 %s714_s13, %s938_s17 }
   0xc   : > { %p88_p6 = scmp.eq.s32.totalorder %s525_s15, 1  ;;  %p47_p7 = scmp.eq.s32.totalorder %s44_s20, 0 }
   0xd   : > { %p785_p8 = por %p63_p5, %p62_p3  ;;  %p94_p10 = scmp.eq.s32.totalorder %s526_s16, 1 }
   0xe   : > { %p789_p9 = por %p88_p6, %p56_p1  ;;  %p553_p13 = scmp.lt.s32.totalorder %s718_s14, 2 }
   0xf   : > { %s794_s23 = scalar_select %p47_p7, %s706_s11, %s49_s18  }
  0x10   : > { %s924_s22 = scalar_select %p789_p9, 1, 0 }
  0x11   : > { %p796_p11 = por %p94_p10, %p62_p3  ;;  %s142_s25 = sand.u32 1, %s706_s11  }
  0x12   : > { %s529_s26 = sshll.u32 %s142_s25, 4  ;;  %s540_s27 = sshll.u32 %s714_s13, 8 }
  0x13   : > { %s925_s24 = scalar_select %p796_p11, 1, 0 }
  0x14   : > { %s807_s30 = scalar_lea.hbm %s918_s0, %s540_s27  ;;  %s146_s3 = scalar_lea.vmem [#allocation2], %s529_s26 }
  0x15   : > { %s157_s4 = sshll.u32 %s146_s3, 4  ;;  %p813_p0 = pnand %p553_p13, %p779_p4  ;;  %s809_s4 = int_to_ptr.vmem [resolvable:$true] %s157_s4 }
  0x16   : > { %s143_s6 = scalar_lea.sflag [#allocation3], %s142_s25  ;;  %s606_s7 = scalar_lea.hbm %s807_s30, 256 }
  0x17   : > { %p607_p3 = scmp.ne.s32.totalorder %s807_s30, %s606_s7  ;;  %p608_p5 = pneg %p813_p0 }
  0x18   : > { %s611_s16 = scalar_lea.hbm %s918_s0, 512  ;;  %p612_p4 = scmp.lt.u32.totalorder %s807_s30, %s918_s0 }
  0x19   : > { %p609_p6 = pnand %p608_p5, %p607_p3  ;;  %p613_p10 = scmp.lt.u32.totalorder %s611_s16, %s606_s7 }
  0x1a   : > { %p615_p12 = scmp.lt.u32.totalorder %s606_s7, %s807_s30 }
  0x1b   : > { %p610_p7 = pneg %p609_p6  ;;  %p614_p13 = por %p613_p10, %p612_p4 }
  0x1d   : > { %p616_p1 = por %p615_p12, %p614_p13 }
  0x1f   : > { %p617_p2 = pnand %p616_p1, %p610_p7 }
  0x21   : > { %620 = shalt.err (!%p617_p2)
}
  0x22   : > { %s621_s20 = scalar_lea.vmem %s809_s4, 256  ;;  %s720_s25 = smov [#allocation2]  }
  0x23   : > { %p622_p3 = scmp.ne.s32.totalorder %s809_s4, %s621_s20  ;;  %s626_s26 = sshll.u32 %s720_s25, 4  ;;  %s627_s26 = int_to_ptr.vmem [resolvable:$false] %s626_s26 }
  0x24   : > { %s628_s27 = scalar_lea.vmem %s627_s26, 512  ;;  %p629_p9 = scmp.lt.s32.totalorder %s809_s4, %s627_s26 }
  0x25   : > { %p624_p6 = pnand %p622_p3, %p608_p5  ;;  %p630_p4 = scmp.lt.s32.totalorder %s628_s27, %s621_s20 }
  0x27   : > { %p625_p11 = pneg %p624_p6  ;;  %p631_p10 = por %p630_p4, %p629_p9 }
  0x29   : > { %p632_p12 = pnand %p631_p10, %p625_p11 }
  0x2b   : > { %635 = shalt.err (!%p632_p12)
}
  0x2c   : > { %548 = dma.hbm_to_vmem [thread:$0]  (!%p813_p0), %s807_s30, 256, %s809_s4, %s143_s6  }
  0x2d   : > { %p927_p1 = scmp.lt.s32.totalorder %s718_s14, 3  ;;  %p928_p2 = scmp.ge.s32.totalorder %s718_s14, 1 }
  0x2f   : > { %p163_p5 = pnand %p928_p2, %p927_p1 }
  0x30   : > { %s849_s28 = sand.u32 (!%p163_p5), 1, %s702_s10  }
  0x31   : > { %166 = sbr.rel (%p163_p5) target bundleno = 294 (0x126), region = 24  ;;  %s533_s29 = sshll.u32 (!%p163_p5), %s849_s28, 4 }
  0x32   : > { %s169_s3 = scalar_lea.sflag (!%p163_p5), [#allocation3], %s849_s28  ;;  %s172_s7 = scalar_lea.vmem (!%p163_p5), [#allocation2], %s533_s29 }
  0x38   : > { %689 = dma.done.wait (%p785_p8), %s169_s3, 256  }
  0x39   : > { %691 = vsyncadd (%p785_p8), %s169_s3, 4294967040  ;;  %vm365_vm0 = vcmask 1043456   ;;  %v217_v0 = vld [vmem:[%s172_s7] sm:$0xff]  ;;  %v218_v1 = vld [vmem:[%s172_s7 + $0x8] sm:$0xff]  ;;  %p202_p8 = scmp.lt.s32.totalorder %s710_s12, 1  ;;  %s534_s30 = sshll.u32 %s849_s28, 2 }
  0x3a   : > { %v221_v2 = vcombine.high %v217_v0, %v217_v0  ;;  %v222_v3 = vcombine.high %v218_v1, %v218_v1  ;;  %v366_v4 = vsel %vm365_vm0, %v217_v0, 0.0  ;;  %v369_v6 = vsel %vm365_vm0, %v218_v1, 0.0  ;;  %s190_s5 = scalar_lea.vmem [#allocation5], %s534_s30  ;;  %s537_s16 = sshll.u32 %s710_s12, 6 }
  0x3b   : > { %s203_s21 = scalar_select %p202_p8, %s710_s12, 1  ;;  %vm213_vm1 = vcmask 27648   ;;  %v721_v11 = vmov 0.0   ;;  %vm215_vm2 = vcmask 3072  }
  0x3c   : > { %225 = vmatprep.subr.mxu0 %v221_v2  ;;  %295 = vmatprep.subr.mxu1 %v222_v3  ;;  %v367_v5 = vsel %vm365_vm0, %v221_v2, 0.0  ;;  %v371_v8 = vsel %vm365_vm0, %v222_v3, 0.0  ;;  %214 = vst.msk [vmem:[%s190_s5] sm:$0xf] %vm213_vm1, %v721_v11  ;;  %s405_s18 = sshll.u32 %s190_s5, 4  ;;  %s868_s25 = scalar_lea.hbm %s919_s1, %s537_s16  ;;  %s870_s18 = int_to_ptr.vmem [resolvable:$true] %s405_s18 }
  0x3d   : > { %226 = vmatpush1.xpose.msra.mxu0 %v217_v0  ;;  %296 = vmatpush1.xpose.msra.mxu1 %v218_v1  ;;  %v368_v7 = vadd.f32 %v367_v5, %v366_v4  ;;  %s535_s4 = sshll.u32 %s203_s21, 2  ;;  %s384_s26 = scalar_lea.sflag [#allocation4], %s849_s28 }
  0x3e   : > { %289 = vmatprep.mubr.f32.mxu0 %v221_v2  ;;  %359 = vmatprep.mubr.f32.mxu1 %v222_v3  ;;  %s208_s15 = scalar_lea.vmem %s920_s2, %s535_s4  ;;  %s636_s27 = scalar_lea.vmem %s870_s18, 64 }
  0x3f   : > { %v370_v9 = vadd.f32 %v369_v6, %v368_v7  ;;  %216 = vst.msk [vmem:[%s208_s15] sm:$0xf] %vm215_vm2, %v721_v11  ;;  %p637_p9 = scmp.ne.s32.totalorder %s870_s18, %s636_s27  ;;  %p929_p11 = scmp.ne.s32.totalorder %s924_s22, 0 }
  0x40   : > { %290 = vmatmul.mubr.f32.vlgmr.msra.gmra.mrb[0].mxu0 %v217_v0  ;;  %360 = vmatmul.mubr.f32.vlgmr.msra.gmra.mrb[0].mxu1 %v218_v1  ;;  %s722_s12 = smov [#allocation5]  }
  0x41   : > { %v372_v10 = vadd.f32 %v371_v8, %v370_v9  ;;  %p638_p0 = pnand %p637_p9, %p929_p11  ;;  %s640_s29 = sshll.u32 %s722_s12, 4  ;;  %s641_s29 = int_to_ptr.vmem [resolvable:$false] %s640_s29 }
  0x42   : > { %s642_s3 = scalar_lea.vmem %s641_s29, 128  ;;  %p643_p13 = scmp.lt.s32.totalorder %s870_s18, %s641_s29 }
  0x43   : > { %373 = vadd.xlane.f32.xlu0 %v372_v10  ;;  %v375_v17 = vld [vmem:[%s190_s5] sm:$0xf]  ;;  %p639_p7 = pneg %p638_p0  ;;  %p644_p3 = scmp.lt.s32.totalorder %s642_s3, %s636_s27 }
  0x45   : > { %p645_p6 = por %p644_p3, %p643_p13 }
  0x46   : > { %v379_v12 = vld [vmem:[%s208_s15] sm:$0xf] }
  0x47   : > { %p646_p4 = pnand %p645_p6, %p639_p7 }
  0xd0   : > { %v374_v13 = vpop.xlane.xlu0 %373 }
  0xd1   : > { %v380_v14 = vadd.f32 %v379_v12, %v374_v13 }
  0xd3   : > { %382 = vst.msk [vmem:[%s208_s15] sm:$0xf] %vm215_vm2, %v380_v14 }
 0x113   : > { %v291_v15 = vpop.f32.mrb[0].mxu0  ;;  %v361_v16 = vpop.f32.mrb[0].mxu1 }
 0x114   : > { %v362_v18 = vadd.f32 %v361_v16, %v291_v15  ;;  %v293_v19 = vpop.f32.mrb[1].mxu0  ;;  %v363_v20 = vpop.f32.mrb[1].mxu1 }
 0x116   : > { %v376_v21 = vadd.f32 %v375_v17, %v362_v18 }
 0x118   : > { %378 = vst.msk [vmem:[%s190_s5] sm:$0xf] %vm213_vm1, %v376_v21 }
 0x119   : > { %649 = shalt.err (!%p646_p4)
}
 0x11a   : > { %s650_s28 = scalar_lea.hbm %s868_s25, 64  ;;  %s654_s30 = scalar_lea.hbm %s919_s1, 128 }
 0x11b   : > { %p651_p10 = scmp.ne.s32.totalorder %s868_s25, %s650_s28  ;;  %p655_p2 = scmp.lt.u32.totalorder %s868_s25, %s919_s1 }
 0x11c   : > { %p656_p5 = scmp.lt.u32.totalorder %s654_s30, %s650_s28  ;;  %p658_p9 = scmp.lt.u32.totalorder %s650_s28, %s868_s25 }
 0x11d   : > { %p652_p12 = pnand %p651_p10, %p929_p11 }
 0x11e   : > { %p657_p8 = por %p656_p5, %p655_p2 }
 0x11f   : > { %p653_p1 = pneg %p652_p12 }
 0x120   : > { %p659_p0 = por %p658_p9, %p657_p8 }
 0x122   : > { %p660_p7 = pnand %p659_p0, %p653_p1 }
 0x124   : > { %663 = shalt.err (!%p660_p7)
}
 0x125   : > { %543 = dma.vmem_to_hbm [thread:$0]  (%p929_p11), %s870_s18, 64, %s868_s25, %s384_s26  }
 0x126 PF: > { %s420_s6 = sand.u32 1, %s698_s9   ;;  %p930_p13 = scmp.ne.s32.totalorder %s925_s24, 0 }
 0x127   : > { %p931_p3 = scmp.ge.s32.totalorder %s718_s14, 2  ;;  %s421_s8 = scalar_lea.sflag [#allocation4], %s420_s6 }
 0x129   : > { %p550_p6 = pnand %p931_p3, %p930_p13 }
 0x12b   : > { %693 = dma.done.wait (!%p550_p6), %s421_s8, 64  }
 0x12c   : > { %695 = vsyncadd (!%p550_p6), %s421_s8, 4294967232  ;;  %s19_s14 = sadd.s32 1, %s718_s14   ;;  %s932_s9 = smov %s702_s10 }
 0x12d   : > { %p16_p4 = scmp.ge.s32.totalorder %s19_s14, 4   ;;  %s933_s10 = smov %s706_s11 }
 0x12e   : > { %s934_s11 = smov %s794_s23  ;;  %s935_s12 = smov %s714_s13 }
 0x12f   : > { %s936_s13 = smov %s938_s17  ;;  %18 = sbr.rel (!%p16_p4) target bundleno = 6 (0x6), region = 85 }
 0x136   :  { %436 = vsyncpa [#allocation3], 1 }
 0x137   :  { %438 = vsyncpa [#allocation3 + $0x1], 1 }
 0x138   :  { %439 = vsyncpa [#allocation4], 1 }
 0x139   :  { %441 = vsyncpa [#allocation4 + $0x1], 1 }

</bundles_post_ra>
